<compile_context>
chip_gen: v7x
topology: tpu7x:2x2x1
jax: 0.10.0
libtpu: 0.0.40
codegen_flags: <defaults>
</compile_context>

<pallas_src>
import math

import jax
import jax.numpy as jnp
from jax import lax
from jax.experimental import pallas as pl
from jax.experimental.pallas import tpu as pltpu


def _tokenizer_kernel(x_ref, wa_ref, wv_ref, out_ref):
    """One grid step = one batch element.

    x_ref:   (1, C, N)  activations, native Conv1d NCW layout
    wa_ref:  (L, C)     bf16 W_a with the 1/sqrt(C) scale folded in
    wv_ref:  (D, C)     bf16 W_v
    out_ref: (1, L, D)  lane-dense output; wrapper transposes to (B, D, L)
    """
    x = x_ref[0].astype(jnp.bfloat16)                        # (C, N) bf16 MXU operand
    # A = (W_a / sqrt(C)) @ X  -> (L, N), f32 accumulation.
    a = jnp.dot(wa_ref[...], x, preferred_element_type=jnp.float32)
    # Softmax over spatial positions (PyTorch dim=2 == last axis here), kept
    # unnormalized; the exact 1/sum is folded into the tiny (L, C) intermediate.
    m = jnp.max(a, axis=1, keepdims=True)                    # (L, 1)
    p = jnp.exp(a - m)                                       # (L, N) f32
    s = jnp.sum(p, axis=1, keepdims=True)                    # (L, 1)
    # T = attn_unnorm @ X^T : contract N (last axis of both operands) -> (L, C).
    t = lax.dot_general(p.astype(jnp.bfloat16), x,
                        (((1,), (1,)), ((), ())),
                        preferred_element_type=jnp.float32)  # (L, C) f32
    t = t * (1.0 / s)                                        # exact softmax normalization
    # out[l, d] = sum_c t[l, c] * W_v[d, c]  (contract C; D stays on lanes).
    out = lax.dot_general(t.astype(jnp.bfloat16), wv_ref[...],
                          (((1,), (1,)), ((), ())),
                          preferred_element_type=jnp.float32)  # (L, D) f32
    out_ref[0] = out.astype(out_ref.dtype)


def _vmem_need_bytes(C, N, L, D, x_itemsize, out_itemsize):
    """Rough per-grid-step VMEM footprint (double-buffered blocks + temporaries)."""
    x_blk = 2 * C * N * x_itemsize                 # double-buffered X block
    x_cast = C * N * 2 if x_itemsize > 2 else 0    # in-kernel bf16 copy of X
    w_blk = 2 * (L + D) * C * 2                    # double-buffered bf16 weights
    interm = L * N * (4 + 4 + 2) + L * C * (4 + 2) + L * D * 4
    out_blk = 2 * L * D * out_itemsize             # double-buffered output block
    return x_blk + x_cast + w_blk + interm + out_blk


def filter_based_tokenizer(x_ncw, w_a, w_v):
    """x_ncw: (B, C, N)  (PyTorch Conv1d layout, consumed natively — no transpose)
       w_a:   (L, C, 1)  Conv1d weight, no bias
       w_v:   (D, C, 1)  Conv1d weight, no bias
       returns (B, D, L), matching torch.bmm(V, attention_weights)."""
    B, C, N = x_ncw.shape
    L = w_a.shape[0]
    D = w_v.shape[0]
    out_dtype = x_ncw.dtype

    # One-time, tiny weight prep: fold 1/sqrt(C) into W_a and cast both to bf16.
    scale = 1.0 / math.sqrt(C)
    wa2 = (w_a[:, :, 0] * scale).astype(jnp.bfloat16)        # (L, C)
    wv2 = w_v[:, :, 0].astype(jnp.bfloat16)                  # (D, C)

    need = _vmem_need_bytes(C, N, L, D, x_ncw.dtype.itemsize,
                            jnp.dtype(out_dtype).itemsize)
    try:
        vmem_cap = int(pltpu.get_tpu_info().vmem_capacity_bytes)
    except Exception:
        vmem_cap = 64 * 1024 * 1024                          # conservative (v7x)
    vmem_limit = int(min(max(need + (4 << 20), 32 << 20), vmem_cap - (2 << 20)))
    # TODO(synk): if 2*C*N*itemsize alone exceeds the budget (e.g. C>=2048 with
    # N=3136 on a 64 MiB-VMEM part), add a trailing "arbitrary" N grid axis with
    # an online softmax + rescaled (L, C) accumulation.

    out_bld = pl.pallas_call(
        _tokenizer_kernel,
        out_shape=jax.ShapeDtypeStruct((B, L, D), out_dtype),
        grid_spec=pltpu.PrefetchScalarGridSpec(
            num_scalar_prefetch=0,
            grid=(B,),
            in_specs=[
                pl.BlockSpec((1, C, N), lambda b: (b, 0, 0)),
                # Constant-index weight blocks: fetched once, reused every step.
                # (pl.Buffered(1) would drop the redundant second buffer on
                #  64 MiB parts; left on the default pipelining path here.)
                pl.BlockSpec((L, C), lambda b: (0, 0)),
                pl.BlockSpec((D, C), lambda b: (0, 0)),
            ],
            out_specs=pl.BlockSpec((1, L, D), lambda b: (b, 0, 0)),
        ),
        compiler_params=pltpu.CompilerParams(
            dimension_semantics=("parallel",),
            vmem_limit_bytes=vmem_limit,
        ),
    )(x_ncw, wa2, wv2)

    # Tiny (B, L, D) -> module's (B, D, L); negligible next to the (B, C, N) input.
    return jnp.transpose(out_bld, (0, 2, 1))


def _reference(x_ncw, w_a, w_v):
    """Pure-JAX reference mirroring the PyTorch forward (f32)."""
    C = x_ncw.shape[1]
    a = jnp.einsum("lc,bcn->bln", w_a[:, :, 0], x_ncw) / jnp.sqrt(jnp.float32(C))
    v = jnp.einsum("dc,bcn->bdn", w_v[:, :, 0], x_ncw)
    attn = jax.nn.softmax(a, axis=2)                 # (B, L, N)
    attn = jnp.transpose(attn, (0, 2, 1))            # (B, N, L)
    return jnp.einsum("bdn,bnl->bdl", v, attn)       # (B, D, L)


if __name__ == "__main__":
    # small, module-consistent shapes
    B = 2                 # batch
    C = 32                # feature_map_cs
    N = 64                # flattened spatial positions (e.g. 8x8)
    L = 8                 # n_visual_tokens
    D = 64                # visual_tokens_cs (small test value)

    key = jax.random.PRNGKey(0)
    kx, ka, kv = jax.random.split(key, 3)

    x = jax.random.normal(kx, (B, C, N), dtype=jnp.float32)
    # deterministic synthetic Conv1d weights (kaiming-ish scale)
    w_a = jax.random.normal(ka, (L, C, 1), dtype=jnp.float32) * (1.0 / math.sqrt(C))
    w_v = jax.random.normal(kv, (D, C, 1), dtype=jnp.float32) * (1.0 / math.sqrt(C))

    out = jax.block_until_ready(filter_based_tokenizer(x, w_a, w_v))
    ref = jax.block_until_ready(_reference(x, w_a, w_v))

    assert out.shape == (B, D, L), out.shape
    max_err = float(jnp.max(jnp.abs(out - ref)))
    # bf16 MXU operands (X, p, T, weights) with f32 accumulation -> loose tolerance
    assert jnp.allclose(out, ref, atol=3e-2, rtol=3e-2), max_err
    print("KERNEL_OK")
</pallas_src>

<mosaic_0001>
module attributes {stable_mosaic.version = 11 : i64} {
  func.func @_tokenizer_kernel(%arg0: i32, %arg1: memref<1x32x64xf32, #tpu.memory_space<vmem>>, %arg2: memref<8x32xbf16, #tpu.memory_space<vmem>>, %arg3: memref<64x32xbf16, #tpu.memory_space<vmem>>, %arg4: memref<1x8x64xf32, #tpu.memory_space<vmem>>) attributes {dimension_semantics = [#tpu.dimension_semantics<parallel>], iteration_bounds = array<i64: 2>, scalar_prefetch = 0 : i64, scratch_operands = 0 : i64, tpu.core_type = #tpu.core_type<tc>, window_params = [{transform_indices = @transform_0, window_bounds = array<i64: 1, 32, 64>}, {pipeline_mode = #tpu.pipeline_mode<synchronous>, transform_indices = @transform_1, window_bounds = array<i64: 8, 32>}, {pipeline_mode = #tpu.pipeline_mode<synchronous>, transform_indices = @transform_2, window_bounds = array<i64: 64, 32>}, {transform_indices = @transform_3, window_bounds = array<i64: 1, 8, 64>}]} {
    %c0 = arith.constant 0 : index
    %c0_0 = arith.constant 0 : index
    %c0_1 = arith.constant 0 : index
    %0 = vector.load %arg1[%c0, %c0_0, %c0_1] : memref<1x32x64xf32, #tpu.memory_space<vmem>>, vector<1x32x64xf32>
    %1 = vector.shape_cast %0 : vector<1x32x64xf32> to vector<32x64xf32>
    %2 = arith.truncf %1 : vector<32x64xf32> to vector<32x64xbf16>
    %c0_2 = arith.constant 0 : index
    %c0_3 = arith.constant 0 : index
    %3 = vector.load %arg2[%c0_2, %c0_3] : memref<8x32xbf16, #tpu.memory_space<vmem>>, vector<8x32xbf16>
    %cst = arith.constant dense<0.000000e+00> : vector<8x64xf32>
    %4 = tpu.matmul %3, %2, %cst {dimension_numbers = #tpu.dot_dimension_numbers<[1], [0], [0], [1], [0, 0, 1, 1], [], []>} : vector<8x32xbf16>, vector<32x64xbf16>, vector<8x64xf32> -> vector<8x64xf32>
    %cst_4 = arith.constant dense<0xFF800000> : vector<8xf32>
    %5 = vector.multi_reduction <maximumf>, %4, %cst_4 [1] : vector<8x64xf32> to vector<8xf32>
    %6 = vector.shape_cast %5 : vector<8xf32> to vector<8x1xf32>
    %7 = vector.broadcast %6 : vector<8x1xf32> to vector<8x64xf32>
    %8 = arith.subf %4, %7 : vector<8x64xf32>
    %9 = math.exp %8 : vector<8x64xf32>
    %cst_5 = arith.constant dense<0.000000e+00> : vector<8xf32>
    %10 = vector.multi_reduction <add>, %9, %cst_5 [1] : vector<8x64xf32> to vector<8xf32>
    %11 = vector.shape_cast %10 : vector<8xf32> to vector<8x1xf32>
    %12 = arith.truncf %9 : vector<8x64xf32> to vector<8x64xbf16>
    %cst_6 = arith.constant dense<0.000000e+00> : vector<8x32xf32>
    %13 = tpu.matmul %12, %2, %cst_6 {dimension_numbers = #tpu.dot_dimension_numbers<[1], [1], [0], [0], [0, 0, 1, 0], [], []>} : vector<8x64xbf16>, vector<32x64xbf16>, vector<8x32xf32> -> vector<8x32xf32>
    %cst_7 = arith.constant 1.000000e+00 : f32
    %14 = vector.broadcast %cst_7 : f32 to vector<8x1xf32>
    %15 = arith.divf %14, %11 : vector<8x1xf32>
    %16 = vector.broadcast %15 : vector<8x1xf32> to vector<8x32xf32>
    %17 = arith.mulf %13, %16 : vector<8x32xf32>
    %18 = arith.truncf %17 : vector<8x32xf32> to vector<8x32xbf16>
    %c0_8 = arith.constant 0 : index
    %c0_9 = arith.constant 0 : index
    %19 = vector.load %arg3[%c0_8, %c0_9] : memref<64x32xbf16, #tpu.memory_space<vmem>>, vector<64x32xbf16>
    %cst_10 = arith.constant dense<0.000000e+00> : vector<8x64xf32>
    %20 = tpu.matmul %18, %19, %cst_10 {dimension_numbers = #tpu.dot_dimension_numbers<[1], [1], [0], [0], [0, 0, 1, 0], [], []>} : vector<8x32xbf16>, vector<64x32xbf16>, vector<8x64xf32> -> vector<8x64xf32>
    %c0_11 = arith.constant 0 : index
    %c0_12 = arith.constant 0 : index
    %c0_13 = arith.constant 0 : index
    %21 = vector.load %arg4[%c0_11, %c0_12, %c0_13] : memref<1x8x64xf32, #tpu.memory_space<vmem>>, vector<1x8x64xf32>
    %22 = vector.shape_cast %21 : vector<1x8x64xf32> to vector<8x64xf32>
    %23 = vector.shape_cast %20 : vector<8x64xf32> to vector<1x8x64xf32>
    tpu.vector_store %arg4[%c0_11, %c0_12, %c0_13], %23 {strides = array<i32>} : memref<1x8x64xf32, #tpu.memory_space<vmem>>, vector<1x8x64xf32>,
    return
  }
  func.func @transform_0(%arg0: i32) -> (i32, i32, i32) {
    %c0_i32 = arith.constant 0 : i32
    %c0_i32_0 = arith.constant 0 : i32
    %c0_i32_1 = arith.constant 0 : i32
    return %arg0, %c0_i32, %c0_i32_0 : i32, i32, i32
  }
  func.func @transform_1(%arg0: i32) -> (i32, i32) {
    %c0_i32 = arith.constant 0 : i32
    %c0_i32_0 = arith.constant 0 : i32
    %c0_i32_1 = arith.constant 0 : i32
    return %c0_i32, %c0_i32_0 : i32, i32
  }
  func.func @transform_2(%arg0: i32) -> (i32, i32) {
    %c0_i32 = arith.constant 0 : i32
    %c0_i32_0 = arith.constant 0 : i32
    %c0_i32_1 = arith.constant 0 : i32
    return %c0_i32, %c0_i32_0 : i32, i32
  }
  func.func @transform_3(%arg0: i32) -> (i32, i32, i32) {
    %c0_i32 = arith.constant 0 : i32
    %c0_i32_0 = arith.constant 0 : i32
    %c0_i32_1 = arith.constant 0 : i32
    return %arg0, %c0_i32, %c0_i32_0 : i32, i32, i32
  }
}

</mosaic_0001>

<bundles_post_ra>
// kernel: tpu_custom_call.1
= control target key start
LH: loop header
LB: loop body
LE: loop exit
PB: predicated region body
PF: predicated region fallthrough
CT: control target
= control target key end

     0   :  { %8 = vsyncpa [#allocation3], 0  ;;  %s906_s0 = inlined_call_operand.hbm [shape: f32[2,32,64], index: 0, kind: input, shape index: {}]   ;;  %s907_s1 = inlined_call_operand.vmem [shape: bf16[8,32], index: 1, kind: input, shape index: {}]   ;;  %s908_s2 = inlined_call_operand.vmem [shape: bf16[64,32], index: 2, kind: input, shape index: {}]   ;;  %s909_s3 = inlined_call_operand.hbm [shape: f32[2,8,64], index: 3, kind: output, shape index: {}]  }
   0x1   :  { %10 = vsyncpa [#allocation3 + $0x1], 0 }
   0x2   :  { %11 = vsyncpa [#allocation4], 0 }
   0x3   :  { %13 = vsyncpa [#allocation4 + $0x1], 0  ;;  %s715_s12 = smov 0   ;;  %s717_s13 = smov 0  }
   0x4   :  { %s719_s14 = smov 0   ;;  %s721_s15 = smov 0  }
   0x5 LB: > { %s736_s16 = sadd.s32 4294967295, %s687_s15   ;;  %s473_s17 = sadd.s32 4294967294, %s687_s15   ;;  %s687_s15 = sphi %s721_s15, %s922_s15   ;;  %s683_s14 = sphi %s719_s14, %s921_s14   ;;  %s679_s13 = sphi %s717_s13, %s920_s13   ;;  %s675_s12 = sphi %s715_s12, %s919_s12  }
   0x6   : > { %s740_s18 = sadd.s32 1, %s687_s15   ;;  %s26_s19 = sadd.s32 1, %s683_s14 }
   0x7   : > { %s23_s20 = ssub.s32 %s687_s15, %s740_s18  ;;  %p33_p0 = scmp.ne.s32.totalorder %s683_s14, %s679_s13 }
   0x8   : > { %p24_p1 = scmp.eq.s32.totalorder %s23_s20, 0  ;;  %p34_p2 = scmp.eq.s32.totalorder %s687_s15, 0 }
   0x9   : > { %p39_p3 = scmp.ne.s32.totalorder %s679_s13, %s675_s12  ;;  %p40_p4 = scmp.eq.s32.totalorder %s736_s16, 0 }
   0xa   : > { %s752_s21 = scalar_select %p24_p1, %s683_s14, %s26_s19  }
   0xb   : > { %p754_p5 = por %p34_p2, %p33_p0  ;;  %p758_p6 = por %p40_p4, %p39_p3 }
   0xc   : > { %p105_p7 = scmp.eq.s32.totalorder %s736_s16, 1  ;;  %p111_p8 = scmp.eq.s32.totalorder %s473_s17, 1 }
   0xd   : > { %p545_p10 = scmp.lt.s32.totalorder %s687_s15, 2  ;;  %s137_s26 = sand.u32 1, %s683_s14  }
   0xe   : > { %p765_p11 = por %p105_p7, %p33_p0  ;;  %p769_p12 = por %p111_p8, %p39_p3 }
   0xf   : > { %s493_s27 = sshll.u32 %s687_s15, 9  ;;  %s476_s28 = sshll.u32 %s137_s26, 5 }
  0x10   : > { %s913_s24 = scalar_select %p765_p11, 1, 0 }
  0x11   : > { %s914_s25 = scalar_select %p769_p12, 1, 0 }
  0x12   : > { %s778_s4 = scalar_lea.hbm %s906_s0, %s493_s27  ;;  %s141_s5 = scalar_lea.vmem [#allocation2], %s476_s28 }
  0x13   : > { %s148_s6 = sshll.u32 %s141_s5, 4  ;;  %p782_p13 = pnand %p545_p10, %p754_p5  ;;  %s786_s6 = int_to_ptr.vmem [resolvable:$true] %s148_s6 }
  0x14   : > { %s788_s8 = scalar_lea.sflag [#allocation3], %s137_s26  ;;  %s591_s9 = scalar_lea.hbm %s778_s4, 512 }
  0x15   : > { %p592_p0 = scmp.ne.s32.totalorder %s778_s4, %s591_s9  ;;  %p593_p1 = pneg %p782_p13 }
  0x16   : > { %s596_s17 = scalar_lea.hbm %s906_s0, 1024  ;;  %p597_p4 = scmp.lt.u32.totalorder %s778_s4, %s906_s0 }
  0x17   : > { %p594_p2 = pnand %p593_p1, %p592_p0  ;;  %p598_p5 = scmp.lt.u32.totalorder %s596_s17, %s591_s9 }
  0x18   : > { %p600_p8 = scmp.lt.u32.totalorder %s591_s9, %s778_s4 }
  0x19   : > { %p595_p3 = pneg %p594_p2  ;;  %p599_p7 = por %p598_p5, %p597_p4 }
  0x1b   : > { %p601_p10 = por %p600_p8, %p599_p7 }
  0x1d   : > { %p602_p9 = pnand %p601_p10, %p595_p3 }
  0x1f   : > { %605 = shalt.err (!%p602_p9)
}
  0x20   : > { %s606_s22 = scalar_lea.vmem %s786_s6, 512  ;;  %s689_s26 = smov [#allocation2]  }
  0x21   : > { %p607_p0 = scmp.ne.s32.totalorder %s786_s6, %s606_s22  ;;  %s611_s27 = sshll.u32 %s689_s26, 4  ;;  %s612_s27 = int_to_ptr.vmem [resolvable:$false] %s611_s27 }
  0x22   : > { %s613_s28 = scalar_lea.vmem %s612_s27, 1024  ;;  %p614_p11 = scmp.lt.s32.totalorder %s786_s6, %s612_s27 }
  0x23   : > { %p609_p2 = pnand %p607_p0, %p593_p1  ;;  %p615_p4 = scmp.lt.s32.totalorder %s613_s28, %s606_s22 }
  0x25   : > { %p610_p12 = pneg %p609_p2  ;;  %p616_p5 = por %p615_p4, %p614_p11 }
  0x27   : > { %p617_p7 = pnand %p616_p5, %p610_p12 }
  0x29   : > { %620 = shalt.err (!%p617_p7)
}
  0x2a   : > { %s690_s29 = smov 128   ;;  %s691_s30 = smov 8  }
  0x2b   : > { %540 = dma.hbm_to_vmem [thread:$0]  (!%p782_p13), %s778_s4, 512, %s786_s6, %s788_s8, %s690_s29, %s690_s29, %s691_s30  }
  0x2c   : > { %p479_p9 = scmp.ge.s32.totalorder %s687_s15, 1  ;;  %p156_p1 = scmp.lt.s32.totalorder %s687_s15, 3 }
  0x2e   : > { %p157_p3 = pnand %p479_p9, %p156_p1 }
  0x2f   : > { %s819_s5 = sand.u32 (!%p157_p3), 1, %s679_s13  }
  0x30   : > { %160 = sbr.rel (%p157_p3) target bundleno = 881 (0x371), region = 32  ;;  %s480_s9 = sshll.u32 (!%p157_p3), %s819_s5, 5 }
  0x31   : > { %s163_s10 = scalar_lea.sflag (!%p157_p3), [#allocation3], %s819_s5  ;;  %s166_s11 = scalar_lea.vmem (!%p157_p3), [#allocation2], %s480_s9 }
  0x37   : > { %666 = dma.done.wait (%p758_p6), %s163_s10, 512  }
  0x38   : > { %668 = vsyncadd (%p758_p6), %s163_s10, 4294966784  ;;  %v692_v0 = vmov 0.0   ;;  %vm693_vm0 = vmmov 0   ;;  %v190_v1 = vld [vmem:[%s166_s11] sm:$0xff]  ;;  %v191_v2 = vld [vmem:[%s166_s11 + $0x8] sm:$0xff]  ;;  %vm197_vm1 = vcmask 261120  }
  0x39   : > { %505 = vmatprep.subr.bf16.mxu1 %v692_v0  ;;  %509 = vmatprep.mubr.msk.bf16.mxu1 %vm693_vm0, %v692_v0  ;;  %v192_v3 = vld [vmem:[%s166_s11 + $0x10] sm:$0xff]  ;;  %v194_v4 = vpack.c.bf16 %v191_v2, %v190_v1  ;;  %v193_v5 = vld [vmem:[%s166_s11 + $0x18] sm:$0xff]  ;;  %v196_v7 = vld [vmem:[%s907_s1] sm:$0xf]  ;;  %vm241_vm2 = vcmask 523264   ;;  %s481_s27 = sshll.u32 %s819_s5, 3 }
  0x3a   : > { %521 = vmatprep.subr.bf16.mxu0 %v692_v0  ;;  %529 = vmatprep.mubr.msk.bf16.mxu0 %vm693_vm0, %v692_v0  ;;  %v195_v6 = vpack.c.bf16 %v193_v5, %v192_v3  ;;  %v583_v21 = vld [vmem:[%s908_s2] sm:$0xff]   ;;  %v584_v23 = vld [vmem:[%s908_s2 + $0x8] sm:$0xff]   ;;  %v585_v25 = vld [vmem:[%s908_s2 + $0x10] sm:$0xff]   ;;  %s490_s28 = sshll.u32 %s736_s16, 7  ;;  %s188_s29 = scalar_lea.vmem [#allocation5], %s481_s27 }
  0x3b   : > { %506 = vmatpush3.bf16.msra.mxu1 %v194_v4  ;;  %v256_v13 = vsel %vm241_vm2, %v194_v4, 0  ;;  %v337_v22 = vsel %vm197_vm1, %v583_v21, 0  ;;  %v340_v24 = vsel %vm197_vm1, %v584_v23, 0  ;;  %v343_v26 = vsel %vm197_vm1, %v585_v25, 0  ;;  %v586_v27 = vld [vmem:[%s908_s2 + $0x18] sm:$0xff]   ;;  %s403_s30 = sshll.u32 %s188_s29, 4  ;;  %s861_s11 = scalar_lea.hbm %s909_s3, %s490_s28  ;;  %s863_s30 = int_to_ptr.vmem [resolvable:$true] %s403_s30 }
  0x3c   : > { %507 = vmatprep.subr.bf16.mxu1 %v692_v0  ;;  %v259_v14 = vsel %vm241_vm2, %v195_v6, 0  ;;  %522 = vmatpush3.bf16.xpose.msra.mxu0 %v337_v22  ;;  %v346_v28 = vsel %vm197_vm1, %v586_v27, 0  ;;  %s390_s4 = scalar_lea.sflag [#allocation4], %s819_s5  ;;  %s621_s23 = scalar_lea.vmem %s863_s30, 128 }
  0x3d   : > { %523 = vmatprep.subr.bf16.mxu0 %v692_v0  ;;  %p622_p6 = scmp.ne.s32.totalorder %s863_s30, %s621_s23  ;;  %p916_p11 = scmp.ne.s32.totalorder %s913_s24, 0 }
  0x3e   : > { %s694_s16 = smov [#allocation5]  }
  0x3f   : > { %508 = vmatpush3.bf16.msra.mxu1 %v195_v6  ;;  %p623_p12 = pnand %p622_p6, %p916_p11  ;;  %s625_s6 = sshll.u32 %s694_s16, 4  ;;  %s626_s6 = int_to_ptr.vmem [resolvable:$false] %s625_s6 }
  0x40   : > { %513 = vmatprep.subr.bf16.mxu1 %v692_v0  ;;  %s627_s7 = scalar_lea.vmem %s626_s6, 256  ;;  %p628_p8 = scmp.lt.s32.totalorder %s863_s30, %s626_s6 }
  0x41   : > { %p624_p13 = pneg %p623_p12  ;;  %p629_p10 = scmp.lt.s32.totalorder %s627_s7, %s621_s23 }
  0x42   : > { %510 = vmatmul.mubr.msk.bf16.vlgmr.msra.gmra.mrb[0].mxu1 %vm197_vm1, %v196_v7 }
  0x43   : > { %517 = vmatprep.mubr.msk.bf16.mxu1 %vm693_vm0, %v692_v0  ;;  %p630_p0 = por %p629_p10, %p628_p8 }
  0x44   : > { %524 = vmatpush3.bf16.xpose.msra.mxu0 %v340_v24 }
  0x45   : > { %525 = vmatprep.subr.bf16.mxu0 %v692_v0  ;;  %p631_p2 = pnand %p630_p0, %p624_p13 }
  0x48   : > { %514 = vmatpush3.bf16.xpose.msra.mxu1 %v256_v13 }
  0x49   : > { %515 = vmatprep.subr.bf16.mxu1 %v692_v0 }
  0x4c   : > { %526 = vmatpush3.bf16.xpose.msra.mxu0 %v343_v26 }
  0x4d   : > { %527 = vmatprep.subr.bf16.mxu0 %v692_v0 }
  0x50   : > { %516 = vmatpush3.bf16.xpose.msra.mxu1 %v259_v14 }
  0x54   : > { %528 = vmatpush3.bf16.xpose.msra.mxu0 %v346_v28 }
 0x115   : > { %v235_v8 = vpop.f32.mrb[0].mxu1 }
 0x116   : > { %v511_v9 = vpop.f32.mrb[1].mxu1  ;;  %v242_v10 = vsel %vm241_vm2, %v235_v8, -inf }
 0x117   : > { %243 = vmax.xlane.f32.xlu0 %v242_v10  ;;  %v238_v11 = vpop.f32.mrb[2].mxu1 }
 0x118   : > { %v512_v12 = vpop.f32.mrb[3].mxu1 }
 0x1a4   : > { %v244_v15 = vpop.xlane.xlu0 %243 }
 0x1a5   : > { %v245_v16 = vsub.f32 %v235_v8, %v244_v15 }
 0x1a7   : > { %v246_v17 = vmul.f32 1.442695, %v245_v16 }
 0x1a9   : > { %587 = vpow2.f32 %v246_v17 }
 0x1b3   : > { %v588_v18 = vpop.eup %587 }
 0x1b4   : > { %v248_v19 = vsel %vm241_vm2, %v588_v18, 0.0  ;;  %v251_v20 = vpack.c.bf16 %v588_v18, %v588_v18 }
 0x1b5   : > { %249 = vadd.xlane.f32.xlu0 %v248_v19 }
 0x1b6   : > { %518 = vmatmul.mubr.msk.bf16.vlgmr.msra.gmra.mrb[4].mxu1 %vm241_vm2, %v251_v20 }
 0x242   : > { %v250_v29 = vpop.xlane.xlu0 %249 }
 0x243   : > { %589 = vrcp.f32 %v250_v29 }
 0x24d   : > { %v590_v30 = vpop.eup %589 }
 0x289   : > { %v295_v31 = vpop.f32.mrb[4].mxu1 }
 0x28a   : > { %v303_v32 = vmul.f32 %v590_v30, %v295_v31  ;;  %v519_v33 = vpop.f32.mrb[5].mxu1 }
 0x28b   : > { %v298_v34 = vpop.f32.mrb[6].mxu1 }
 0x28c   : > { %v304_v35 = vpack.c.bf16 %v303_v32, %v303_v32  ;;  %v520_v36 = vpop.f32.mrb[7].mxu1 }
 0x28e   : > { %530 = vmatmul.mubr.msk.bf16.vlgmr.msra.gmra.mrb[0].mxu0 %vm197_vm1, %v304_v35 }
 0x361   : > { %v382_v37 = vpop.f32.mrb[0].mxu0 }
 0x362   : > { %388 = vst.msk [vmem:[%s188_s29] sm:$0xff] %vm241_vm2, %v382_v37  ;;  %v531_v38 = vpop.f32.mrb[1].mxu0 }
 0x363   : > { %v385_v39 = vpop.f32.mrb[2].mxu0 }
 0x364   : > { %634 = shalt.err (!%p631_p2)
}
 0x365   : > { %s635_s5 = scalar_lea.hbm %s861_s11, 128  ;;  %s639_s19 = scalar_lea.hbm %s909_s3, 256 }
 0x366   : > { %p636_p4 = scmp.ne.s32.totalorder %s861_s11, %s635_s5  ;;  %p640_p9 = scmp.lt.u32.totalorder %s861_s11, %s909_s3 }
 0x367   : > { %p641_p1 = scmp.lt.u32.totalorder %s639_s19, %s635_s5  ;;  %p643_p6 = scmp.lt.u32.totalorder %s635_s5, %s861_s11 }
 0x368   : > { %p637_p5 = pnand %p636_p4, %p916_p11 }
 0x369   : > { %p642_p3 = por %p641_p1, %p640_p9 }
 0x36a   : > { %p638_p7 = pneg %p637_p5 }
 0x36b   : > { %p644_p12 = por %p643_p6, %p642_p3 }
 0x36d   : > { %p645_p13 = pnand %p644_p12, %p638_p7 }
 0x36f   : > { %648 = shalt.err (!%p645_p13)
}
 0x370   : > { %535 = dma.vmem_to_hbm [thread:$0]  (%p916_p11), %s863_s30, 128, %s861_s11, %s390_s4   ;;  %v532_v40 = vpop.f32.mrb[3].mxu0 }
 0x371 PF: > { %s415_s26 = sand.u32 1, %s675_s12   ;;  %p917_p8 = scmp.ne.s32.totalorder %s914_s25, 0 }
 0x372   : > { %p918_p10 = scmp.ge.s32.totalorder %s687_s15, 2  ;;  %s416_s27 = scalar_lea.sflag [#allocation4], %s415_s26 }
 0x374   : > { %p542_p0 = pnand %p918_p10, %p917_p8 }
 0x376   : > { %670 = dma.done.wait (!%p542_p0), %s416_s27, 128  }
 0x377   : > { %672 = vsyncadd (!%p542_p0), %s416_s27, 4294967168  ;;  %p16_p2 = scmp.ge.s32.totalorder %s740_s18, 4   ;;  %s919_s12 = smov %s679_s13 }
 0x378   : > { %s920_s13 = smov %s683_s14  ;;  %s921_s14 = smov %s752_s21 }
 0x379   : > { %s922_s15 = smov %s740_s18  ;;  %18 = sbr.rel (!%p16_p2) target bundleno = 5 (0x5), region = 77 }
 0x380   :  { %421 = vsyncpa [#allocation3], 1 }
 0x381   :  { %423 = vsyncpa [#allocation3 + $0x1], 1 }
 0x382   :  { %424 = vsyncpa [#allocation4], 1 }
 0x383   :  { %426 = vsyncpa [#allocation4 + $0x1], 1 }

</bundles_post_ra>
